<compile_context>
chip_gen: v6e
topology: v6e:2x2x1
jax: 0.10.0
libtpu: 0.0.40
codegen_flags: <defaults>
</compile_context>

<pallas_src>
import functools

import jax
import jax.numpy as jnp
from jax.experimental import pallas as pl
from jax.experimental.pallas import tpu as pltpu


OUT_PAD = 128  # pad the 2-wide output layer to a full 128-lane vreg


def mlp_kernel(x_ref, w1_ref, b1_ref, w2_ref, b2_ref, w3_ref, b3_ref, o_ref):
    # fc1 + relu   (bf16 MXU inputs, f32 accumulation, f32 elementwise)
    x = x_ref[...].astype(jnp.bfloat16)
    h1 = jnp.dot(x, w1_ref[...], preferred_element_type=jnp.float32)
    h1 = jnp.maximum(h1 + b1_ref[...], 0.0)
    # fc2 + relu
    h2 = jnp.dot(h1.astype(jnp.bfloat16), w2_ref[...],
                 preferred_element_type=jnp.float32)
    h2 = jnp.maximum(h2 + b2_ref[...], 0.0)
    # fc3 (no activation); W3/b3 are zero-padded to 128 output lanes
    out = jnp.dot(h2.astype(jnp.bfloat16), w3_ref[...],
                  preferred_element_type=jnp.float32)
    o_ref[...] = (out + b3_ref[...]).astype(o_ref.dtype)


def _round_up(n: int, m: int) -> int:
    return ((n + m - 1) // m) * m


@functools.partial(jax.jit, static_argnames=("block_b",))
def simple_nn_forward(x, w1, b1, w2, b2, w3, b3, *, block_b=None):
    B, in_sz = x.shape
    h1_sz, h2_sz, out_sz = w1.shape[1], w2.shape[1], w3.shape[1]

    if block_b is None:
        # Big batch tiles amortize the ~0.35 us per-grid-step overhead; the
        # 1024 cap keeps the per-step working set (x tile x2 buffers, h1/h2
        # intermediates, 128-lane output tile x2 buffers) ~2 MiB, far below
        # v7x's 32 MiB default scoped VMEM.  Splitting the batch in two first
        # guarantees >=2 parallel grid steps so both v7x TensorCores get work.
        block_b = min(1024, max(8, _round_up(pl.cdiv(B, 2), 8)))

    # Pad batch so the grid covers every row (no silent tail truncation);
    # padded rows compute garbage-free zeros+bias and are sliced off below.
    b_pad = _round_up(B, block_b)
    if b_pad != B:
        x = jnp.pad(x, ((0, b_pad - B), (0, 0)))

    # Lane-dense output: pad the 2-wide last layer to 128 columns of zeros.
    w3p = jnp.pad(w3, ((0, 0), (0, OUT_PAD - out_sz)))
    b3p = jnp.pad(b3, ((0, 0), (0, OUT_PAD - out_sz)))

    # Weights resident in VMEM; feed the MXU at its native bf16 rate.
    w1b = w1.astype(jnp.bfloat16)
    w2b = w2.astype(jnp.bfloat16)
    w3b = w3p.astype(jnp.bfloat16)

    grid = (b_pad // block_b,)
    const2d = lambda i: (0, 0)  # noqa: E731  (weights/biases: fixed block)

    out_padded = pl.pallas_call(
        mlp_kernel,
        out_shape=jax.ShapeDtypeStruct((b_pad, OUT_PAD), jnp.float32),
        grid_spec=pltpu.PrefetchScalarGridSpec(
            num_scalar_prefetch=0,
            grid=grid,
            in_specs=[
                pl.BlockSpec((block_b, in_sz), lambda i: (i, 0)),   # x tile
                pl.BlockSpec((in_sz, h1_sz), const2d),              # W1
                pl.BlockSpec((1, h1_sz), const2d),                  # b1
                pl.BlockSpec((h1_sz, h2_sz), const2d),              # W2
                pl.BlockSpec((1, h2_sz), const2d),                  # b2
                pl.BlockSpec((h2_sz, OUT_PAD), const2d),            # W3 (padded)
                pl.BlockSpec((1, OUT_PAD), const2d),                # b3 (padded)
            ],
            out_specs=pl.BlockSpec((block_b, OUT_PAD), lambda i: (i, 0)),
        ),
        compiler_params=pltpu.CompilerParams(
            dimension_semantics=("parallel",),
        ),
    )(x, w1b, b1, w2b, b2, w3b, b3p)

    return out_padded[:B, :out_sz]


def init_params(key, input_size):
    # Deterministic init mimicking PyTorch's Kaiming-uniform default for Linear.
    def linear_init(k, fan_in, fan_out):
        kw, kb = jax.random.split(k)
        bound = 1.0 / jnp.sqrt(fan_in)
        w = jax.random.uniform(kw, (fan_in, fan_out), jnp.float32, -bound, bound)
        b = jax.random.uniform(kb, (1, fan_out), jnp.float32, -bound, bound)
        return w, b

    k1, k2, k3 = jax.random.split(key, 3)
    w1, b1 = linear_init(k1, input_size, 128)
    w2, b2 = linear_init(k2, 128, 64)
    w3, b3 = linear_init(k3, 64, 2)
    return w1, b1, w2, b2, w3, b3


def reference_forward(x, w1, b1, w2, b2, w3, b3):
    # Matches the kernel's numerics: bf16 dot inputs, f32 accumulation,
    # f32 bias-add / ReLU.
    bf = jnp.bfloat16
    h = jnp.dot(x.astype(bf), w1.astype(bf), preferred_element_type=jnp.float32) + b1
    h = jnp.maximum(h, 0.0)
    h = jnp.dot(h.astype(bf), w2.astype(bf), preferred_element_type=jnp.float32) + b2
    h = jnp.maximum(h, 0.0)
    return jnp.dot(h.astype(bf), w3.astype(bf), preferred_element_type=jnp.float32) + b3


if __name__ == "__main__":
    key = jax.random.PRNGKey(0)
    kx, kx2, kp = jax.random.split(key, 3)

    input_size = 32
    params = init_params(kp, input_size)

    # Case 1: batch divisible by the tile.
    batch = 16
    x = jax.random.normal(kx, (batch, input_size), dtype=jnp.float32)
    out = jax.block_until_ready(simple_nn_forward(x, *params))
    ref = reference_forward(x, *params)
    assert out.shape == (batch, 2), out.shape
    assert jnp.allclose(out, ref, atol=1e-3, rtol=1e-3), "mismatch vs reference (B=16)"

    # Case 2: ragged batch (exercises pl.cdiv-style padding of the tail tile).
    batch2 = 13
    x2 = jax.random.normal(kx2, (batch2, input_size), dtype=jnp.float32)
    out2 = jax.block_until_ready(simple_nn_forward(x2, *params))
    ref2 = reference_forward(x2, *params)
    assert out2.shape == (batch2, 2), out2.shape
    assert jnp.allclose(out2, ref2, atol=1e-3, rtol=1e-3), "mismatch vs reference (B=13)"

    print("KERNEL_OK")
</pallas_src>

<mosaic_0001>
module attributes {stable_mosaic.version = 11 : i64} {
  func.func @mlp_kernel(%arg0: i32, %arg1: memref<8x32xf32, #tpu.memory_space<vmem>>, %arg2: memref<32x128xbf16, #tpu.memory_space<vmem>>, %arg3: memref<1x128xf32, #tpu.memory_space<vmem>>, %arg4: memref<128x64xbf16, #tpu.memory_space<vmem>>, %arg5: memref<1x64xf32, #tpu.memory_space<vmem>>, %arg6: memref<64x128xbf16, #tpu.memory_space<vmem>>, %arg7: memref<1x128xf32, #tpu.memory_space<vmem>>, %arg8: memref<8x128xf32, #tpu.memory_space<vmem>>) attributes {dimension_semantics = [#tpu.dimension_semantics<parallel>], iteration_bounds = array<i64: 2>, scalar_prefetch = 0 : i64, scratch_operands = 0 : i64, tpu.core_type = #tpu.core_type<tc>, window_params = [{transform_indices = @transform_0, window_bounds = array<i64: 8, 32>}, {pipeline_mode = #tpu.pipeline_mode<synchronous>, transform_indices = @transform_1, window_bounds = array<i64: 32, 128>}, {pipeline_mode = #tpu.pipeline_mode<synchronous>, transform_indices = @transform_2, window_bounds = array<i64: 1, 128>}, {pipeline_mode = #tpu.pipeline_mode<synchronous>, transform_indices = @transform_3, window_bounds = array<i64: 128, 64>}, {pipeline_mode = #tpu.pipeline_mode<synchronous>, transform_indices = @transform_4, window_bounds = array<i64: 1, 64>}, {pipeline_mode = #tpu.pipeline_mode<synchronous>, transform_indices = @transform_5, window_bounds = array<i64: 64, 128>}, {pipeline_mode = #tpu.pipeline_mode<synchronous>, transform_indices = @transform_6, window_bounds = array<i64: 1, 128>}, {transform_indices = @transform_7, window_bounds = array<i64: 8, 128>}]} {
    %c0 = arith.constant 0 : index
    %c0_0 = arith.constant 0 : index
    %0 = vector.load %arg1[%c0, %c0_0] : memref<8x32xf32, #tpu.memory_space<vmem>>, vector<8x32xf32>
    %1 = arith.truncf %0 : vector<8x32xf32> to vector<8x32xbf16>
    %c0_1 = arith.constant 0 : index
    %c0_2 = arith.constant 0 : index
    %2 = vector.load %arg2[%c0_1, %c0_2] : memref<32x128xbf16, #tpu.memory_space<vmem>>, vector<32x128xbf16>
    %cst = arith.constant dense<0.000000e+00> : vector<8x128xf32>
    %3 = tpu.matmul %1, %2, %cst {dimension_numbers = #tpu.dot_dimension_numbers<[1], [0], [0], [1], [0, 0, 1, 1], [], []>} : vector<8x32xbf16>, vector<32x128xbf16>, vector<8x128xf32> -> vector<8x128xf32>
    %c0_3 = arith.constant 0 : index
    %c0_4 = arith.constant 0 : index
    %4 = vector.load %arg3[%c0_3, %c0_4] : memref<1x128xf32, #tpu.memory_space<vmem>>, vector<1x128xf32>
    %5 = vector.broadcast %4 : vector<1x128xf32> to vector<8x128xf32>
    %6 = arith.addf %3, %5 : vector<8x128xf32>
    %cst_5 = arith.constant 0.000000e+00 : f32
    %7 = vector.broadcast %cst_5 : f32 to vector<8x128xf32>
    %8 = arith.maximumf %6, %7 : vector<8x128xf32>
    %9 = arith.truncf %8 : vector<8x128xf32> to vector<8x128xbf16>
    %c0_6 = arith.constant 0 : index
    %c0_7 = arith.constant 0 : index
    %10 = vector.load %arg4[%c0_6, %c0_7] : memref<128x64xbf16, #tpu.memory_space<vmem>>, vector<128x64xbf16>
    %cst_8 = arith.constant dense<0.000000e+00> : vector<8x64xf32>
    %11 = tpu.matmul %9, %10, %cst_8 {dimension_numbers = #tpu.dot_dimension_numbers<[1], [0], [0], [1], [0, 0, 1, 1], [], []>} : vector<8x128xbf16>, vector<128x64xbf16>, vector<8x64xf32> -> vector<8x64xf32>
    %c0_9 = arith.constant 0 : index
    %c0_10 = arith.constant 0 : index
    %12 = vector.load %arg5[%c0_9, %c0_10] : memref<1x64xf32, #tpu.memory_space<vmem>>, vector<1x64xf32>
    %13 = vector.broadcast %12 : vector<1x64xf32> to vector<8x64xf32>
    %14 = arith.addf %11, %13 : vector<8x64xf32>
    %cst_11 = arith.constant 0.000000e+00 : f32
    %15 = vector.broadcast %cst_11 : f32 to vector<8x64xf32>
    %16 = arith.maximumf %14, %15 : vector<8x64xf32>
    %17 = arith.truncf %16 : vector<8x64xf32> to vector<8x64xbf16>
    %c0_12 = arith.constant 0 : index
    %c0_13 = arith.constant 0 : index
    %18 = vector.load %arg6[%c0_12, %c0_13] : memref<64x128xbf16, #tpu.memory_space<vmem>>, vector<64x128xbf16>
    %cst_14 = arith.constant dense<0.000000e+00> : vector<8x128xf32>
    %19 = tpu.matmul %17, %18, %cst_14 {dimension_numbers = #tpu.dot_dimension_numbers<[1], [0], [0], [1], [0, 0, 1, 1], [], []>} : vector<8x64xbf16>, vector<64x128xbf16>, vector<8x128xf32> -> vector<8x128xf32>
    %c0_15 = arith.constant 0 : index
    %c0_16 = arith.constant 0 : index
    %20 = vector.load %arg7[%c0_15, %c0_16] : memref<1x128xf32, #tpu.memory_space<vmem>>, vector<1x128xf32>
    %21 = vector.broadcast %20 : vector<1x128xf32> to vector<8x128xf32>
    %22 = arith.addf %19, %21 : vector<8x128xf32>
    %c0_17 = arith.constant 0 : index
    %c0_18 = arith.constant 0 : index
    %23 = vector.load %arg8[%c0_17, %c0_18] : memref<8x128xf32, #tpu.memory_space<vmem>>, vector<8x128xf32>
    tpu.vector_store %arg8[%c0_17, %c0_18], %22 {strides = array<i32>} : memref<8x128xf32, #tpu.memory_space<vmem>>, vector<8x128xf32>,
    return
  }
  func.func @transform_0(%arg0: i32) -> (i32, i32) {
    %c0_i32 = arith.constant 0 : i32
    %c0_i32_0 = arith.constant 0 : i32
    return %arg0, %c0_i32 : i32, i32
  }
  func.func @transform_1(%arg0: i32) -> (i32, i32) {
    %c0_i32 = arith.constant 0 : i32
    %c0_i32_0 = arith.constant 0 : i32
    %c0_i32_1 = arith.constant 0 : i32
    return %c0_i32, %c0_i32_0 : i32, i32
  }
  func.func @transform_2(%arg0: i32) -> (i32, i32) {
    %c0_i32 = arith.constant 0 : i32
    %c0_i32_0 = arith.constant 0 : i32
    %c0_i32_1 = arith.constant 0 : i32
    return %c0_i32, %c0_i32_0 : i32, i32
  }
  func.func @transform_3(%arg0: i32) -> (i32, i32) {
    %c0_i32 = arith.constant 0 : i32
    %c0_i32_0 = arith.constant 0 : i32
    %c0_i32_1 = arith.constant 0 : i32
    return %c0_i32, %c0_i32_0 : i32, i32
  }
  func.func @transform_4(%arg0: i32) -> (i32, i32) {
    %c0_i32 = arith.constant 0 : i32
    %c0_i32_0 = arith.constant 0 : i32
    %c0_i32_1 = arith.constant 0 : i32
    return %c0_i32, %c0_i32_0 : i32, i32
  }
  func.func @transform_5(%arg0: i32) -> (i32, i32) {
    %c0_i32 = arith.constant 0 : i32
    %c0_i32_0 = arith.constant 0 : i32
    %c0_i32_1 = arith.constant 0 : i32
    return %c0_i32, %c0_i32_0 : i32, i32
  }
  func.func @transform_6(%arg0: i32) -> (i32, i32) {
    %c0_i32 = arith.constant 0 : i32
    %c0_i32_0 = arith.constant 0 : i32
    %c0_i32_1 = arith.constant 0 : i32
    return %c0_i32, %c0_i32_0 : i32, i32
  }
  func.func @transform_7(%arg0: i32) -> (i32, i32) {
    %c0_i32 = arith.constant 0 : i32
    %c0_i32_0 = arith.constant 0 : i32
    return %arg0, %c0_i32 : i32, i32
  }
}

</mosaic_0001>

<bundles_post_ra>
// kernel: simple_nn_forward.1
= control target key start
LH: loop header
LB: loop body
LE: loop exit
PB: predicated region body
PF: predicated region fallthrough
CT: control target
= control target key end

     0   :  { %s755_s24 = smov 0   ;;  %s833_s0 = inlined_call_operand.vmem [shape: f32[16,32], index: 0, kind: input, shape index: {}]   ;;  %s834_s1 = inlined_call_operand.vmem [shape: bf16[32,128], index: 1, kind: input, shape index: {}]   ;;  %s835_s2 = inlined_call_operand.vmem [shape: f32[1,128], index: 2, kind: input, shape index: {}]   ;;  %s836_s3 = inlined_call_operand.vmem [shape: bf16[128,64], index: 3, kind: input, shape index: {}]   ;;  %s837_s4 = inlined_call_operand.vmem [shape: f32[1,64], index: 4, kind: input, shape index: {}]   ;;  %s838_s5 = inlined_call_operand.vmem [shape: bf16[64,128], index: 5, kind: input, shape index: {}]   ;;  %s839_s6 = inlined_call_operand.vmem [shape: f32[1,128], index: 6, kind: input, shape index: {}]   ;;  %s840_s7 = inlined_call_operand.vmem [shape: f32[16,128], index: 7, kind: output, shape index: {}]  }
   0x1 LB: > { %s596_s25 = sadd.s32 4294967295, %s711_s24   ;;  %p600_p0 = scmp.ge.s32.totalorder %s711_s24, 1  ;;  %s711_s24 = sphi %s755_s24, %s17_s24  }
   0x2   : > { %p236_p1 = scmp.lt.s32.totalorder %s711_s24, 3 }
   0x4   : > { %p237_p2 = pnand %p600_p0, %p236_p1 }
   0x5   : > { %p266_p3 = scmp.lt.s32.totalorder (!%p237_p2), %s596_s25, 1 }
   0x6   : > { %240 = sbr.rel (%p237_p2) target bundleno = 617 (0x269), region = 48 }
   0xb   : > { %v691_v0 = vld [vmem:[%s834_s1 + $0x8] sm:$0xff]   ;;  %v713_v1 = vmov 0.0   ;;  %v692_v2 = vld [vmem:[%s834_s1] sm:$0xff]   ;;  %vm714_vm0 = vmmov 0   ;;  %v693_v3 = vld [vmem:[%s836_s3 + $0x38] sm:$0xff]   ;;  %s842_s25 = smov (!%p266_p3, %s596_s25), 1 }
   0xc   : > { %641 = vmatprep.subr.bf16.mxu0 %v713_v1  ;;  %649 = vmatprep.subr.bf16.mxu1 %v713_v1  ;;  %v694_v4 = vld [vmem:[%s836_s3 + $0x30] sm:$0xff]   ;;  %s601_s11 = sshll.u32 %s842_s25, 3  ;;  %vm300_vm1 = vcmask 261120   ;;  %v695_v6 = vld [vmem:[%s836_s3 + $0x28] sm:$0xff]   ;;  %v696_v8 = vld [vmem:[%s836_s3 + $0x20] sm:$0xff]   ;;  %vm498_vm2 = vcmask 523264  }
   0xd   : > { %642 = vmatpush3.bf16.msra.mxu0 %v691_v0  ;;  %645 = vmatprep.mubr.msk.bf16.mxu0 %vm714_vm0, %v713_v1  ;;  %s269_s14 = scalar_lea.vmem %s833_s0, %s601_s11  ;;  %v697_v9 = vld [vmem:[%s836_s3 + $0x18] sm:$0xff]   ;;  %v698_v10 = vld [vmem:[%s836_s3 + $0x10] sm:$0xff]   ;;  %v699_v11 = vld [vmem:[%s836_s3 + $0x8] sm:$0xff]   ;;  %s273_s23 = scalar_lea.vmem %s840_s7, %s601_s11 }
   0xe   : > { %643 = vmatprep.subr.bf16.mxu0 %v713_v1  ;;  %665 = vmatprep.mubr.msk.bf16.mxu1 %vm714_vm0, %v713_v1  ;;  %v275_v5 = vld [vmem:[%s269_s14] sm:$0xff]  ;;  %v701_v13 = vld [vmem:[%s838_s5 + $0x18] sm:$0xff]   ;;  %v702_v14 = vld [vmem:[%s838_s5 + $0x10] sm:$0xff]  }
   0xf   : > { %650 = vmatpush3.bf16.msra.mxu1 %v693_v3  ;;  %v276_v7 = vpack.c.bf16 %v275_v5, %v275_v5  ;;  %v700_v12 = vld [vmem:[%s836_s3] sm:$0xff]   ;;  %v703_v23 = vld [vmem:[%s838_s5 + $0x8] sm:$0xff]  }
  0x10   : > { %651 = vmatprep.subr.bf16.mxu1 %v713_v1  ;;  %v603_v15 = vld [vmem:[%s835_s2] ss:$0 sm:$0xff] }
  0x11   : > { %644 = vmatpush3.bf16.msra.mxu0 %v692_v2  ;;  %v704_v24 = vld [vmem:[%s838_s5] sm:$0xff]  }
  0x12   : > { %669 = vmatprep.subr.bf16.mxu0 %v713_v1  ;;  %v607_v25 = vld [vmem:[%s837_s4] ss:$0 sm:$0xff] }
  0x13   : > { %652 = vmatpush3.bf16.msra.mxu1 %v694_v4  ;;  %v616_v33 = vld [vmem:[%s839_s6] ss:$0 sm:$0xff] }
  0x14   : > { %653 = vmatprep.subr.bf16.mxu1 %v713_v1  ;;  %646 = vmatmul.mubr.msk.bf16.vlgmr.msra.gmra.mxu0 %vm300_vm1, %v276_v7 }
  0x15   : > { %677 = vmatprep.mubr.msk.bf16.mxu0 %vm714_vm0, %v713_v1  ;;  %670 = vmatpush3.bf16.msra.mxu0 %v701_v13 }
  0x16   : > { %671 = vmatprep.subr.bf16.mxu0 %v713_v1 }
  0x17   : > { %654 = vmatpush3.bf16.msra.mxu1 %v695_v6 }
  0x18   : > { %655 = vmatprep.subr.bf16.mxu1 %v713_v1 }
  0x19   : > { %672 = vmatpush3.bf16.msra.mxu0 %v702_v14 }
  0x1a   : > { %673 = vmatprep.subr.bf16.mxu0 %v713_v1 }
  0x1b   : > { %656 = vmatpush3.bf16.msra.mxu1 %v696_v8 }
  0x1c   : > { %657 = vmatprep.subr.bf16.mxu1 %v713_v1 }
  0x1d   : > { %674 = vmatpush3.bf16.msra.mxu0 %v703_v23 }
  0x1e   : > { %675 = vmatprep.subr.bf16.mxu0 %v713_v1 }
  0x1f   : > { %658 = vmatpush3.bf16.msra.mxu1 %v697_v9 }
  0x20   : > { %659 = vmatprep.subr.bf16.mxu1 %v713_v1 }
  0x21   : > { %676 = vmatpush3.bf16.msra.mxu0 %v704_v24 }
  0x23   : > { %660 = vmatpush3.bf16.msra.mxu1 %v698_v10 }
  0x24   : > { %661 = vmatprep.subr.bf16.mxu1 %v713_v1 }
  0x27   : > { %662 = vmatpush3.bf16.msra.mxu1 %v699_v11 }
  0x28   : > { %663 = vmatprep.subr.bf16.mxu1 %v713_v1 }
  0x2b   : > { %664 = vmatpush3.bf16.msra.mxu1 %v700_v12 }
  0xd4   : > { %v338_v16 = vpop.f32.mrf.mxu0 }
  0xd5   : > { %v339_v17 = vadd.f32 %v603_v15, %v338_v16 }
  0xd6   : > { %v647_v18 = vpop.f32.mrf.mxu0 }
  0xd7   : > { %v344_v19 = vmax.f32 %v339_v17, 0.0 }
  0xd8   : > { %v341_v20 = vpop.f32.mrf.mxu0 }
  0xd9   : > { %v345_v21 = vpack.c.bf16 %v344_v19, %v344_v19 }
  0xda   : > { %v648_v22 = vpop.f32.mrf.mxu0 }
  0xdb   : > { %666 = vmatmul.mubr.bf16.vlgmr.msra.gmra.mxu1 %v345_v21 }
 0x19b   : > { %v451_v26 = vpop.f32.mrf.mxu1 }
 0x19c   : > { %v452_v27 = vadd.f32 %v607_v25, %v451_v26 }
 0x19d   : > { %v667_v28 = vpop.f32.mrf.mxu1 }
 0x19e   : > { %v457_v29 = vmax.f32 %v452_v27, 0.0 }
 0x19f   : > { %v454_v30 = vpop.f32.mrf.mxu1 }
 0x1a0   : > { %v458_v31 = vpack.c.bf16 %v457_v29, %v457_v29 }
 0x1a1   : > { %v668_v32 = vpop.f32.mrf.mxu1 }
 0x1a2   : > { %678 = vmatmul.mubr.msk.bf16.vlgmr.msra.gmra.mxu0 %vm498_vm2, %v458_v31 }
 0x262   : > { %v536_v34 = vpop.f32.mrf.mxu0 }
 0x263   : > { %v537_v35 = vadd.f32 %v616_v33, %v536_v34 }
 0x264   : > { %v679_v36 = vpop.f32.mrf.mxu0 }
 0x265   : > { %542 = vst [vmem:[%s273_s23] sm:$0xff] %v537_v35 }
 0x266   : > { %v539_v37 = vpop.f32.mrf.mxu0 }
 0x268   : > { %v680_v38 = vpop.f32.mrf.mxu0 }
 0x269 PF: > { %s17_s24 = sadd.s32 1, %s711_s24  }
 0x26a   : > { %p14_p4 = scmp.ge.s32.totalorder %s17_s24, 4  }
 0x26c   :  { %16 = sbr.rel (!%p14_p4) target bundleno = 1 (0x1), region = 78 }

</bundles_post_ra>
